<compile_context>
chip_gen: v7x
topology: tpu7x:2x2x1
jax: 0.10.0
libtpu: 0.0.40
codegen_flags: <defaults>
</compile_context>

<pallas_src>
import math
from functools import partial

import jax
import jax.numpy as jnp
from jax import lax
from jax.experimental import pallas as pl
from jax.experimental.pallas import tpu as pltpu


# ---------------------------------------------------------------------------
# Kernel
# ---------------------------------------------------------------------------
def _downsample_kernel(x_ref, *rest, n_steps, tiles, h_levels, ragged_rows,
                       ragged_w, lanes0, total_lanes0, mxu_dtype):
    """Fused chain of Down blocks on one (row-tile x width-tile) block.

    x_ref : (T0, Wt0*C0)   lane-dense input rows for this grid block
    rest  : (P_0, ..., P_{n-1}, o_ref, scratch_1, ..., scratch_{n-1})
      P_s       : (Wt_s*C_s, Wt_{s+1}*C_{s+1}) folded [col 2-avg + 1x1 conv]
      o_ref     : (T_n, Wt_n*C_n)
      scratch_s : (T_s, Wt_s*C_s) f32 VMEM used for the level-s row-pair sum
    """
    p_refs = rest[:n_steps]
    o_ref = rest[n_steps]
    scratch = rest[n_steps + 1:]
    hb = pl.program_id(1)
    wb = pl.program_id(2)

    # ---- level 0: row-pair sum via stride-2 sublane loads from the block.
    t0, t1 = tiles[0], tiles[1]
    top = x_ref[pl.ds(0, t1, stride=2), :].astype(jnp.float32)
    bot = x_ref[pl.ds(1, t1, stride=2), :].astype(jnp.float32)
    if ragged_rows:
        valid = h_levels[0] - hb * t0        # image rows inside this block
        r2 = 2 * lax.broadcasted_iota(jnp.int32, (t1, 1), 0)
        top = jnp.where(r2 < valid, top, 0.0)
        bot = jnp.where(r2 + 1 < valid, bot, 0.0)
    x = top + bot
    if ragged_w:
        # Last width tile overhangs the image: kill the garbage lanes.
        lane = lax.broadcasted_iota(jnp.int32, (1, lanes0), 1)
        x = jnp.where(lane < total_lanes0 - wb * lanes0, x, 0.0)
    if ragged_rows:
        # P_s folds a 1/2 row factor; windows with a single valid row need *2
        # (count_include_pad=False).  Fully-invalid windows stay exactly zero.
        x = x * jnp.where(valid - r2 == 1, 2.0, 1.0)
    x = jnp.dot(x.astype(mxu_dtype), p_refs[0][...],
                preferred_element_type=jnp.float32)

    # ---- deeper levels: spill to VMEM scratch, redo the stride-2 row sum on
    # the VPU; the MXU only sees the (folded) conv matmuls.
    for s in range(1, n_steps):
        buf = scratch[s - 1]
        buf[...] = x
        t_cur, t_next = tiles[s], tiles[s + 1]
        top = buf[pl.ds(0, t_next, stride=2), :]
        bot = buf[pl.ds(1, t_next, stride=2), :]
        x = top + bot
        if ragged_rows:
            valid_s = h_levels[s] - hb * t_cur
            i2 = 2 * lax.broadcasted_iota(jnp.int32, (t_next, 1), 0)
            x = x * jnp.where(valid_s - i2 == 1, 2.0, 1.0)
        x = jnp.dot(x.astype(mxu_dtype), p_refs[s][...],
                    preferred_element_type=jnp.float32)

    o_ref[...] = x.astype(o_ref.dtype)


# ---------------------------------------------------------------------------
# Wrapper helpers
# ---------------------------------------------------------------------------
def _lcm(a, b):
    return a * b // math.gcd(a, b)


def _vmem_budgets():
    """(per-block byte budget, vmem_limit_bytes) -- generation aware."""
    vmem = None
    try:
        vmem = getattr(pltpu.get_tpu_info(), "vmem_capacity_bytes", None)
    except Exception:
        vmem = None
    if vmem is None:
        vmem = 128 << 20
    if vmem <= (64 << 20):           # v7x: 64 MiB per TensorCore
        return 4 << 20, 48 << 20
    return 8 << 20, 96 << 20         # v5e / v6e: 128 MiB


def _pool_conv_matrix(w, width_true, width_in, width_out, dtype):
    """(width_in*Cin, width_out*Cout) fold of the 2-wide column average (with
    count_include_pad=False edge counts), a 1/2 row factor and the 1x1 conv.

    Input columns >= width_true (tile overhang) get zero weight; output
    columns >= ceil(width_true/2) are zero."""
    cin, cout = w.shape
    wn_true = -(-width_true // 2)
    src = jnp.arange(width_in)[:, None]
    dst = jnp.arange(width_out)[None, :]
    sel = ((src // 2 == dst) & (src < width_true) & (dst < wn_true))
    sel = sel.astype(jnp.float32)
    j = jnp.arange(width_out)
    col_cnt = jnp.clip(jnp.minimum(2 * (j + 1), width_true) - 2 * j, 1, 2)
    sel = sel / (2.0 * col_cnt.astype(jnp.float32))[None, :]
    p = jnp.einsum("wj,cd->wcjd", sel, w.astype(jnp.float32))
    return p.reshape(width_in * cin, width_out * cout).astype(dtype)


def _choose_w_tile(width, c0, c_last, n_steps, target_lanes=512):
    """Level-0 width tile, or None for a single tile spanning the full width."""
    factor = 1 << n_steps
    if width * c0 <= 2 * target_lanes:
        return None                                   # small: one tile is fine
    base = _lcm(factor, 128 // math.gcd(c0, 128))     # input lanes 128-aligned
    unit = None
    for k in range(1, 65):                            # output lanes 128-aligned
        if ((base * k >> n_steps) * c_last) % 128 == 0:
            unit = base * k
            break
    if unit is None:
        return None
    wt = unit * max(1, target_lanes // (unit * c0))
    return None if wt >= width else wt


def _choose_row_tile(height, h_out, factor, bytes_per_out_row, budget,
                     row_tile=None, other_blocks=1):
    """Output rows per grid block (+ rare host-side row padding fallback)."""
    if row_tile is None:
        limit = max(8, int(budget // max(1, bytes_per_out_row)) // 8 * 8)
        if h_out < 8:
            row_tile = h_out
        else:
            row_tile = min(limit, (h_out // 8) * 8)
            # keep both v7x TensorCores busy when the rest of the grid is 1x1
            if other_blocks == 1 and row_tile >= h_out and h_out >= 16:
                row_tile = max(8, (h_out // 2) // 8 * 8)
    row_tile = min(row_tile, h_out)
    t_in = row_tile * factor
    pad_rows = 0
    ok_out = (row_tile % 8 == 0) or (row_tile == h_out)
    ok_in = (t_in % 8 == 0) or (t_in == height)
    if not (ok_out and ok_in):
        # Last resort (tiny odd H): one row block + a tiny host-side zero pad.
        row_tile = h_out
        t_in = row_tile * factor
        if t_in != height and t_in % 8 != 0:
            pad_rows = t_in - height
    return row_tile, pad_rows


def _variant_index_map(n_wb):
    last = n_wb - 1

    def index_map(nb, hb, wb):
        return (wb // last, 0, 0)          # 0 = interior tile, 1 = edge tile

    return index_map


# ---------------------------------------------------------------------------
# Forward
# ---------------------------------------------------------------------------
def downsample_forward(x_nhwc, params, *, row_tile=None, w_tile=None,
                       mxu_dtype=jnp.bfloat16):
    """Full DownSample forward (NHWC in, NHWC out) as one fused Pallas kernel.

    mxu_dtype: dtype of the MXU operands (fold matrices and x tiles).  bf16 by
    default; pass jnp.float32 if tighter-than-~1e-2 accuracy is required.
    """
    if not params:
        return x_nhwc
    n_batch, height, width, chan0 = x_nhwc.shape
    n_steps = len(params)
    factor = 1 << n_steps

    chans = [chan0] + [int(w.shape[1]) for w in params]
    for s, w in enumerate(params):
        assert w.shape[0] == chans[s], "channel chain mismatch"

    # True feature-map heights per level (for in-kernel edge masking).
    h_levels = [height]
    for s in range(n_steps):
        h_levels.append(-(-h_levels[s] // 2))
    h_out = h_levels[n_steps]
    w_out = -(-width // factor)

    # ---- width tiling ------------------------------------------------------
    if w_tile is None:
        w_tile = _choose_w_tile(width, chans[0], chans[-1], n_steps)
    if w_tile is not None:
        if (w_tile % factor or w_tile >= width
                or (w_tile * chans[0]) % 128
                or ((w_tile >> n_steps) * chans[-1]) % 128):
            w_tile = None                 # fall back to a single full-width tile
    wt0 = width if w_tile is None else w_tile
    n_wb = -(-width // wt0)
    ragged_w = (width % wt0) != 0

    # Padded tile-width trajectory (exact halvings for interior tiles; the
    # ceil chain when a single tile spans the full, possibly odd, width).
    wp = [wt0]
    for s in range(n_steps):
        wp.append(-(-wp[s] // 2))
    lanes0 = wp[0] * chans[0]
    lanes_out = wp[n_steps] * chans[n_steps]

    # ---- row tiling ----------------------------------------------------------
    budget, vmem_limit = _vmem_budgets()
    in_item = x_nhwc.dtype.itemsize
    bytes_per_out_row = (factor * lanes0 * (2 * in_item + 8)
                         + lanes_out * (2 * x_nhwc.dtype.itemsize + 8))
    row_tile_out, pad_rows = _choose_row_tile(
        height, h_out, factor, bytes_per_out_row, budget,
        row_tile, other_blocks=n_batch * n_wb)
    t_in = row_tile_out * factor
    tiles = tuple(row_tile_out << (n_steps - s) for s in range(n_steps + 1))
    n_hb = -(-h_out // row_tile_out)
    ragged_rows = (height % t_in) != 0

    x = x_nhwc
    if pad_rows:
        x = jnp.pad(x, ((0, 0), (0, pad_rows), (0, 0), (0, 0)))

    # ---- folded [column 2-avg + 1x1 conv] matrices, per level / per variant.
    two_variant = ragged_w and n_wb > 1
    edge_w = [width - (n_wb - 1) * wt0]
    for s in range(n_steps):
        edge_w.append(-(-edge_w[s] // 2))
    p_mats = []
    for s in range(n_steps):
        interior = _pool_conv_matrix(params[s], wp[s], wp[s], wp[s + 1],
                                     mxu_dtype)
        if two_variant:
            edge = _pool_conv_matrix(params[s], edge_w[s], wp[s], wp[s + 1],
                                     mxu_dtype)
            p_mats.append(jnp.stack([interior, edge], axis=0))
        else:
            p_mats.append(interior)

    # ---- specs ---------------------------------------------------------------
    x2 = x.reshape(n_batch, x.shape[1], width * chans[0])   # free: W,C contiguous

    in_specs = [pl.BlockSpec((None, t_in, lanes0),
                             lambda nb, hb, wb: (nb, hb, wb))]
    for pm in p_mats:
        if two_variant:
            in_specs.append(pl.BlockSpec((None,) + pm.shape[1:],
                                         _variant_index_map(n_wb)))
        else:
            in_specs.append(pl.BlockSpec(pm.shape, lambda nb, hb, wb: (0, 0)))
    out_spec = pl.BlockSpec((None, row_tile_out, lanes_out),
                            lambda nb, hb, wb: (nb, hb, wb))
    scratch_shapes = [pltpu.VMEM((tiles[s], wp[s] * chans[s]), jnp.float32)
                      for s in range(1, n_steps)]

    kernel = partial(_downsample_kernel, n_steps=n_steps, tiles=tiles,
                     h_levels=tuple(h_levels), ragged_rows=ragged_rows,
                     ragged_w=ragged_w, lanes0=lanes0,
                     total_lanes0=width * chans[0], mxu_dtype=mxu_dtype)

    y2 = pl.pallas_call(
        kernel,
        out_shape=jax.ShapeDtypeStruct(
            (n_batch, h_out, w_out * chans[n_steps]), x_nhwc.dtype),
        grid=(n_batch, n_hb, n_wb),
        in_specs=in_specs,
        out_specs=out_spec,
        scratch_shapes=scratch_shapes,
        compiler_params=pltpu.CompilerParams(
            dimension_semantics=("parallel", "parallel", "parallel"),
            vmem_limit_bytes=vmem_limit,
        ),
    )(x2, *p_mats)

    return y2.reshape(n_batch, h_out, w_out, chans[n_steps])


# ---------------------------------------------------------------------------
# Params / reference
# ---------------------------------------------------------------------------
def init_downsample_params(in_channels, scale_factor, chan_factor=2, seed=0):
    """Deterministic 1x1-conv weights for each Down block: list of (Cin, Cout)."""
    n_steps = int(math.log2(scale_factor))
    key = jax.random.PRNGKey(seed)
    params = []
    c = in_channels
    for _ in range(n_steps):
        c_out = int(c * chan_factor)
        key, sub = jax.random.split(key)
        bound = 1.0 / math.sqrt(c)
        w = jax.random.uniform(sub, (c, c_out), jnp.float32, -bound, bound)
        params.append(w)
        c = c_out
    return params


def downsample_reference(x_nhwc, params):
    """Pure-JAX reference mirroring the PyTorch module (NHWC in/out)."""
    x = x_nhwc
    for w in params:
        n, h, wdt, c = x.shape
        hc, wc = -(-h // 2), -(-wdt // 2)
        xp = jnp.pad(x, ((0, 0), (0, 2 * hc - h), (0, 2 * wc - wdt), (0, 0)))
        summed = xp.reshape(n, hc, 2, wc, 2, c).sum(axis=(2, 4))
        rc = jnp.minimum(2 * (jnp.arange(hc) + 1), h) - 2 * jnp.arange(hc)
        cc = jnp.minimum(2 * (jnp.arange(wc) + 1), wdt) - 2 * jnp.arange(wc)
        cnt = (rc[:, None] * cc[None, :]).astype(jnp.float32)
        pooled = summed / cnt[None, :, :, None]
        x = jnp.einsum("nhwc,cd->nhwd", pooled, w)
    return x


# ---------------------------------------------------------------------------
# Tests
# ---------------------------------------------------------------------------
if __name__ == "__main__":

    def _case(seed, shape, scale_factor, chan_factor, expected_shape,
              row_tile=None, w_tile=None):
        key = jax.random.PRNGKey(seed)
        x = jax.random.normal(key, shape, jnp.float32)
        params = init_downsample_params(shape[-1], scale_factor, chan_factor,
                                        seed=seed)
        # Keep test data exactly bf16-representable so the comparison only
        # sees the (intended) bf16 rounding of the MXU operands.
        x = x.astype(jnp.bfloat16).astype(jnp.float32)
        params = [w.astype(jnp.bfloat16).astype(jnp.float32) for w in params]

        out = jax.block_until_ready(
            downsample_forward(x, params, row_tile=row_tile, w_tile=w_tile))
        ref = downsample_reference(x, params)
        assert out.shape == expected_shape, (out.shape, expected_shape)
        err = float(jnp.max(jnp.abs(out - ref)))
        assert jnp.allclose(out, ref, atol=2e-2, rtol=2e-2), err

    # Canonical small case: (N, H, W, C) = (2, 16, 16, 4), scale 4 -> 2 blocks.
    _case(0, (2, 16, 16, 4), 4, 2, (2, 4, 4, 16))
    # Single Down block (scale 2).
    _case(1, (2, 16, 16, 4), 2, 2, (2, 8, 8, 8))
    # Ragged rows + odd width + explicit row tiling (3 row blocks, masked edge).
    _case(2, (1, 67, 10, 3), 4, 2, (1, 17, 3, 12), row_tile=8)
    # Width tiling with a ragged last width tile (two-variant fold matrices).
    _case(3, (1, 21, 40, 8), 4, 2, (1, 6, 10, 32), w_tile=16)
    # Automatic width tiling (W*C0 large enough to trigger it).
    _case(4, (1, 32, 64, 32), 4, 2, (1, 8, 16, 128))

    print("KERNEL_OK")
</pallas_src>

<mosaic_0001>
module attributes {stable_mosaic.version = 11 : i64} {
  func.func @_downsample_kernel(%arg0: i32, %arg1: i32, %arg2: i32, %arg3: memref<1x16x64xf32, #tpu.memory_space<vmem>>, %arg4: memref<64x64xbf16, #tpu.memory_space<vmem>>, %arg5: memref<64x64xbf16, #tpu.memory_space<vmem>>, %arg6: memref<1x4x64xf32, #tpu.memory_space<vmem>>, %arg7: memref<8x64xf32, #tpu.memory_space<vmem>>) attributes {dimension_semantics = [#tpu.dimension_semantics<parallel>, #tpu.dimension_semantics<parallel>, #tpu.dimension_semantics<parallel>], iteration_bounds = array<i64: 2, 1, 1>, scalar_prefetch = 0 : i64, scratch_operands = 1 : i64, tpu.core_type = #tpu.core_type<tc>, window_params = [{transform_indices = @transform_0, window_bounds = array<i64: 1, 16, 64>}, {pipeline_mode = #tpu.pipeline_mode<synchronous>, transform_indices = @transform_1, window_bounds = array<i64: 64, 64>}, {pipeline_mode = #tpu.pipeline_mode<synchronous>, transform_indices = @transform_2, window_bounds = array<i64: 64, 64>}, {transform_indices = @transform_3, window_bounds = array<i64: 1, 4, 64>}]} {
    %c0 = arith.constant 0 : index
    %c0_0 = arith.constant 0 : index
    %c0_1 = arith.constant 0 : index
    %0 = tpu.strided_load %arg3[%c0, %c0_0, %c0_1] {strides = array<i32: 1, 2, 1>} : memref<1x16x64xf32, #tpu.memory_space<vmem>>, vector<1x8x64xf32>
    %1 = vector.shape_cast %0 : vector<1x8x64xf32> to vector<8x64xf32>
    %c0_2 = arith.constant 0 : index
    %c1 = arith.constant 1 : index
    %c0_3 = arith.constant 0 : index
    %2 = tpu.strided_load %arg3[%c0_2, %c1, %c0_3] {strides = array<i32: 1, 2, 1>} : memref<1x16x64xf32, #tpu.memory_space<vmem>>, vector<1x8x64xf32>
    %3 = vector.shape_cast %2 : vector<1x8x64xf32> to vector<8x64xf32>
    %4 = arith.addf %1, %3 : vector<8x64xf32>
    %5 = arith.truncf %4 : vector<8x64xf32> to vector<8x64xbf16>
    %c0_4 = arith.constant 0 : index
    %c0_5 = arith.constant 0 : index
    %6 = vector.load %arg4[%c0_4, %c0_5] : memref<64x64xbf16, #tpu.memory_space<vmem>>, vector<64x64xbf16>
    %cst = arith.constant dense<0.000000e+00> : vector<8x64xf32>
    %7 = tpu.matmul %5, %6, %cst {dimension_numbers = #tpu.dot_dimension_numbers<[1], [0], [0], [1], [0, 0, 1, 1], [], []>} : vector<8x64xbf16>, vector<64x64xbf16>, vector<8x64xf32> -> vector<8x64xf32>
    %c0_6 = arith.constant 0 : index
    %c0_7 = arith.constant 0 : index
    %8 = vector.load %arg7[%c0_6, %c0_7] : memref<8x64xf32, #tpu.memory_space<vmem>>, vector<8x64xf32>
    tpu.vector_store %arg7[%c0_6, %c0_7], %7 {strides = array<i32>} : memref<8x64xf32, #tpu.memory_space<vmem>>, vector<8x64xf32>,
    %c0_8 = arith.constant 0 : index
    %c0_9 = arith.constant 0 : index
    %9 = tpu.strided_load %arg7[%c0_8, %c0_9] {strides = array<i32: 2, 1>} : memref<8x64xf32, #tpu.memory_space<vmem>>, vector<4x64xf32>
    %c1_10 = arith.constant 1 : index
    %c0_11 = arith.constant 0 : index
    %10 = tpu.strided_load %arg7[%c1_10, %c0_11] {strides = array<i32: 2, 1>} : memref<8x64xf32, #tpu.memory_space<vmem>>, vector<4x64xf32>
    %11 = arith.addf %9, %10 : vector<4x64xf32>
    %12 = arith.truncf %11 : vector<4x64xf32> to vector<4x64xbf16>
    %c0_12 = arith.constant 0 : index
    %c0_13 = arith.constant 0 : index
    %13 = vector.load %arg5[%c0_12, %c0_13] : memref<64x64xbf16, #tpu.memory_space<vmem>>, vector<64x64xbf16>
    %cst_14 = arith.constant dense<0.000000e+00> : vector<4x64xf32>
    %14 = tpu.matmul %12, %13, %cst_14 {dimension_numbers = #tpu.dot_dimension_numbers<[1], [0], [0], [1], [0, 0, 1, 1], [], []>} : vector<4x64xbf16>, vector<64x64xbf16>, vector<4x64xf32> -> vector<4x64xf32>
    %c0_15 = arith.constant 0 : index
    %c0_16 = arith.constant 0 : index
    %c0_17 = arith.constant 0 : index
    %15 = vector.load %arg6[%c0_15, %c0_16, %c0_17] : memref<1x4x64xf32, #tpu.memory_space<vmem>>, vector<1x4x64xf32>
    %16 = vector.shape_cast %15 : vector<1x4x64xf32> to vector<4x64xf32>
    %17 = vector.shape_cast %14 : vector<4x64xf32> to vector<1x4x64xf32>
    tpu.vector_store %arg6[%c0_15, %c0_16, %c0_17], %17 {strides = array<i32>} : memref<1x4x64xf32, #tpu.memory_space<vmem>>, vector<1x4x64xf32>,
    return
  }
  func.func @transform_0(%arg0: i32, %arg1: i32, %arg2: i32) -> (i32, i32, i32) {
    %c0_i32 = arith.constant 0 : i32
    return %arg0, %arg1, %arg2 : i32, i32, i32
  }
  func.func @transform_1(%arg0: i32, %arg1: i32, %arg2: i32) -> (i32, i32) {
    %c0_i32 = arith.constant 0 : i32
    %c0_i32_0 = arith.constant 0 : i32
    %c0_i32_1 = arith.constant 0 : i32
    return %c0_i32, %c0_i32_0 : i32, i32
  }
  func.func @transform_2(%arg0: i32, %arg1: i32, %arg2: i32) -> (i32, i32) {
    %c0_i32 = arith.constant 0 : i32
    %c0_i32_0 = arith.constant 0 : i32
    %c0_i32_1 = arith.constant 0 : i32
    return %c0_i32, %c0_i32_0 : i32, i32
  }
  func.func @transform_3(%arg0: i32, %arg1: i32, %arg2: i32) -> (i32, i32, i32) {
    %c0_i32 = arith.constant 0 : i32
    return %arg0, %arg1, %arg2 : i32, i32, i32
  }
}

</mosaic_0001>

<bundles_post_ra>
// kernel: tpu_custom_call.1
= control target key start
LH: loop header
LB: loop body
LE: loop exit
PB: predicated region body
PF: predicated region fallthrough
CT: control target
= control target key end

     0   :  { %8 = vsyncpa [#allocation4], 0  ;;  %s1158_s0 = inlined_call_operand.hbm [shape: f32[2,16,64], index: 0, kind: input, shape index: {}]   ;;  %s1159_s1 = inlined_call_operand.hbm [shape: bf16[64,64], index: 1, kind: input, shape index: {}]   ;;  %s1160_s2 = inlined_call_operand.hbm [shape: bf16[64,64], index: 2, kind: input, shape index: {}]   ;;  %s1161_s3 = inlined_call_operand.hbm [shape: f32[2,4,64], index: 3, kind: output, shape index: {}]  }
   0x1   :  { %10 = vsyncpa [#allocation4 + $0x1], 0 }
   0x2   :  { %11 = vsyncpa [#allocation7], 0 }
   0x3   :  { %12 = vsyncpa [#allocation5], 0 }
   0x4   :  { %14 = vsyncpa [#allocation5 + $0x1], 0  ;;  %s901_s12 = smov 0   ;;  %s903_s13 = smov 0  }
   0x5   :  { %s905_s14 = smov 0   ;;  %s907_s15 = smov 0  }
   0x6   :  { %s909_s16 = smov 0   ;;  %s911_s17 = smov 0  }
   0x7 LB: > { %s536_s18 = sadd.s32 4294967295, %s869_s17   ;;  %s537_s19 = sadd.s32 4294967294, %s869_s17   ;;  %s869_s17 = sphi %s911_s17, %s20_s17   ;;  %s865_s16 = sphi %s909_s16, %s1183_s16   ;;  %s861_s15 = sphi %s907_s15, %s1182_s15   ;;  %s857_s14 = sphi %s905_s14, %s1181_s14   ;;  %s853_s13 = sphi %s903_s13, %s1180_s13   ;;  %s849_s12 = sphi %s901_s12, %s1179_s12  }
   0x8   : > { %p63_p0 = scmp.ne.s32.totalorder %s853_s13, %s849_s12  ;;  %p935_p1 = scmp.eq.s32.totalorder %s536_s18, 0 }
   0x9   : > { %p939_p2 = scmp.eq.s32.totalorder %s536_s18, 1  ;;  %p139_p3 = scmp.eq.s32.totalorder %s537_s19, 1 }
   0xa   : > { %s1166_s20 = scalar_select %p935_p1, 1, 0 }
   0xb   : > { %p945_p4 = por %p935_p1, %p63_p0  ;;  %p538_p5 = scmp.ge.s32.totalorder %s869_s17, 1 }
   0xc   : > { %p950_p6 = por %p139_p3, %p63_p0  ;;  %p146_p7 = scmp.lt.s32.totalorder %s869_s17, 3 }
   0xd   : > { %s1168_s22 = scalar_select %p945_p4, 1, 0 }
   0xe   : > { %s1169_s23 = scalar_select %p950_p6, 1, 0 }
   0xf   : > { %p955_p8 = pnand %p538_p5, %p146_p7  ;;  %s871_s25 = smov [#allocation6]  }
  0x10   : > { %s158_s26 = sshll.u32 %s871_s25, 4  ;;  %s872_s28 = smov [#allocation8]   ;;  %s959_s26 = int_to_ptr.vmem [resolvable:$true] %s158_s26 }
  0x11   : > { %p612_p9 = pneg %p955_p8  ;;  %s171_s29 = sshll.u32 %s872_s28, 4  ;;  %s970_s29 = int_to_ptr.vmem [resolvable:$true] %s171_s29 }
  0x12   : > { %s697_s5 = scalar_lea.hbm %s1159_s1, 512 }
  0x13   : > { %p966_p11 = pnand %p612_p9, %p935_p1  ;;  %p698_p12 = scmp.ne.s32.totalorder %s1159_s1, %s697_s5 }
  0x14   : > { %p704_p5 = scmp.lt.u32.totalorder %s697_s5, %s1159_s1 }
  0x15   : > { %p699_p13 = pneg %p966_p11 }
  0x17   : > { %p700_p0 = pnand %p699_p13, %p698_p12 }
  0x19   : > { %p701_p3 = pneg %p700_p0 }
  0x1b   : > { %p706_p7 = pnand %p704_p5, %p701_p3 }
  0x1d   : > { %709 = shalt.err (!%p706_p7)
}
  0x1e   : > { %s710_s10 = scalar_lea.vmem %s959_s26, 512  ;;  %p718_p1 = scmp.lt.s32.totalorder %s959_s26, %s959_s26 }
  0x1f   : > { %p711_p9 = scmp.ne.s32.totalorder %s959_s26, %s710_s10  ;;  %p719_p12 = scmp.lt.s32.totalorder %s710_s10, %s710_s10 }
  0x21   : > { %p713_p10 = pnand %p711_p9, %p699_p13  ;;  %p720_p0 = por %p719_p12, %p718_p1 }
  0x23   : > { %p714_p6 = pneg %p713_p10 }
  0x25   : > { %p721_p4 = pnand %p720_p0, %p714_p6 }
  0x27   : > { %724 = shalt.err (!%p721_p4)
}
  0x28   : > { %s873_s11 = smov 64   ;;  %s874_s18 = smov 4  }
  0x29   : > { %615 = dma.hbm_to_vmem [thread:$0]  (!%p966_p11), %s1159_s1, 512, %s959_s26, [#allocation7], %s873_s11, %s873_s11, %s874_s18  }
  0x2a   : > { %s725_s4 = scalar_lea.hbm %s1160_s2, 512 }
  0x2b   : > { %p726_p1 = scmp.ne.s32.totalorder %s1160_s2, %s725_s4  ;;  %p732_p10 = scmp.lt.u32.totalorder %s725_s4, %s1160_s2 }
  0x2d   : > { %p728_p4 = pnand %p726_p1, %p699_p13 }
  0x2f   : > { %p729_p6 = pneg %p728_p4 }
  0x31   : > { %p734_p3 = pnand %p732_p10, %p729_p6 }
  0x33   : > { %737 = shalt.err (!%p734_p3)
}
  0x34   : > { %s738_s26 = scalar_lea.vmem %s970_s29, 512  ;;  %p746_p12 = scmp.lt.s32.totalorder %s970_s29, %s970_s29 }
  0x35   : > { %p739_p5 = scmp.ne.s32.totalorder %s970_s29, %s738_s26  ;;  %p747_p0 = scmp.lt.s32.totalorder %s738_s26, %s738_s26 }
  0x37   : > { %p741_p7 = pnand %p739_p5, %p699_p13  ;;  %p748_p1 = por %p747_p0, %p746_p12 }
  0x39   : > { %p742_p9 = pneg %p741_p7 }
  0x3b   : > { %p749_p4 = pnand %p748_p1, %p742_p9 }
  0x3d   : > { %752 = shalt.err (!%p749_p4)
}
  0x3e   : > { %618 = dma.hbm_to_vmem [thread:$0]  (!%p966_p11), %s1160_s2, 512, %s970_s29, [#allocation7], %s873_s11, %s873_s11, %s874_s18  }
  0x3f   : > { %s39_s19 = sadd.s32 1, %s865_s16  ;;  %s50_s25 = sadd.s32 1, %s857_s14 }
  0x40   : > { %p41_p13 = scmp.ge.s32.totalorder %s39_s19, 2  ;;  %p57_p6 = scmp.ne.s32.totalorder %s857_s14, %s853_s13 }
  0x41   : > { %p58_p10 = scmp.eq.s32.totalorder %s869_s17, 0  ;;  %p629_p3 = scmp.lt.s32.totalorder %s869_s17, 2 }
  0x42   : > { %s1185_s19 = smov (%p41_p13, %s39_s19), 0  ;;  %p1034_p7 = por %p939_p2, %p57_p6 }
  0x43   : > { %p59_p5 = por %p58_p10, %p57_p6  ;;  %s43_s28 = ssub.s32 %s865_s16, %s1185_s19 }
  0x44   : > { %s1172_s27 = scalar_select %p1034_p7, 1, 0 }
  0x45   : > { %s185_s30 = sand.u32 1, %s857_s14   ;;  %p48_p9 = scmp.eq.s32.totalorder %s43_s28, 0 }
  0x46   : > { %s542_s29 = sshll.u32 %s185_s30, 4  ;;  %s565_s11 = sshll.u32 %s865_s16, 8 }
  0x47   : > { %s1043_s18 = scalar_select %p48_p9, %s857_s14, %s50_s25  }
  0x48   : > { %s1048_s6 = scalar_lea.hbm %s1158_s0, %s565_s11  ;;  %s189_s21 = scalar_lea.vmem [#allocation3], %s542_s29 }
  0x49   : > { %s199_s7 = sshll.u32 %s189_s21, 4  ;;  %p1052_p2 = pnand %p629_p3, %p59_p5  ;;  %s1056_s7 = int_to_ptr.vmem [resolvable:$true] %s199_s7 }
  0x4a   : > { %s1058_s26 = scalar_lea.sflag [#allocation4], %s185_s30  ;;  %s753_s9 = scalar_lea.hbm %s1048_s6, 256 }
  0x4b   : > { %p754_p11 = scmp.ne.s32.totalorder %s1048_s6, %s753_s9  ;;  %p755_p12 = pneg %p1052_p2 }
  0x4c   : > { %s758_s28 = scalar_lea.hbm %s1158_s0, 512  ;;  %p759_p4 = scmp.lt.u32.totalorder %s1048_s6, %s1158_s0 }
  0x4d   : > { %p756_p0 = pnand %p755_p12, %p754_p11  ;;  %p760_p13 = scmp.lt.u32.totalorder %s758_s28, %s753_s9 }
  0x4e   : > { %p762_p10 = scmp.lt.u32.totalorder %s753_s9, %s1048_s6 }
  0x4f   : > { %p757_p1 = pneg %p756_p0  ;;  %p761_p6 = por %p760_p13, %p759_p4 }
  0x51   : > { %p763_p3 = por %p762_p10, %p761_p6 }
  0x53   : > { %p764_p5 = pnand %p763_p3, %p757_p1 }
  0x55   : > { %767 = shalt.err (!%p764_p5)
}
  0x56   : > { %s768_s30 = scalar_lea.vmem %s1056_s7, 256  ;;  %s875_s4 = smov [#allocation3]  }
  0x57   : > { %p769_p9 = scmp.ne.s32.totalorder %s1056_s7, %s768_s30  ;;  %s773_s5 = sshll.u32 %s875_s4, 4  ;;  %s774_s5 = int_to_ptr.vmem [resolvable:$false] %s773_s5 }
  0x58   : > { %s775_s21 = scalar_lea.vmem %s774_s5, 512  ;;  %p776_p7 = scmp.lt.s32.totalorder %s1056_s7, %s774_s5 }
  0x59   : > { %p771_p11 = pnand %p769_p9, %p755_p12  ;;  %p777_p4 = scmp.lt.s32.totalorder %s775_s21, %s768_s30 }
  0x5b   : > { %p772_p0 = pneg %p771_p11  ;;  %p778_p13 = por %p777_p4, %p776_p7 }
  0x5d   : > { %p779_p6 = pnand %p778_p13, %p772_p0 }
  0x5f   : > { %782 = shalt.err (!%p779_p6)
}
  0x60   : > { %s876_s9 = smov 128   ;;  %s877_s10 = smov 8  }
  0x61   : > { %622 = dma.hbm_to_vmem [thread:$0]  (!%p1052_p2), %s1048_s6, 256, %s1056_s7, %s1058_s26, %s876_s9, %s876_s9, %s877_s10  }
  0x62   : > { %211 = sbr.rel (%p955_p8) target bundleno = 578 (0x242), region = 32  ;;  %s1089_s25 = sand.u32 (!%p955_p8), 1, %s853_s13  }
  0x63   : > { %s546_s28 = sshll.u32 (!%p955_p8), %s1089_s25, 4  ;;  %s214_s29 = scalar_lea.sflag (!%p955_p8), [#allocation4], %s1089_s25 }
  0x64   : > { %s217_s11 = scalar_lea.vmem (!%p955_p8), [#allocation3], %s546_s28  ;;  %p1174_p7 = scmp.ne.s32.totalorder (!%p955_p8), %s1168_s22, 0 }
  0x69   : > { %836 = dma.done.wait (%p1174_p7), %s214_s29, 256  }
  0x6a   : > { %838 = vsyncadd (%p1174_p7), %s214_s29, 4294967040  ;;  %p1175_p12 = scmp.ne.s32.totalorder %s1166_s20, 0 }
  0x6c   : > { %840 = dma.done.wait (%p1175_p12), [#allocation7], 1024  }
  0x6d   : > { %842 = vsyncadd (%p1175_p12), [#allocation7], 4294966272  ;;  %v878_v0 = vmov 0.0   ;;  %vm879_vm0 = vmmov 0   ;;  %v689_v1 = vld [vmem:[#allocation6] sm:$0xff]   ;;  %v690_v2 = vld [vmem:[#allocation6 + $0x8] sm:$0xff]  }
  0x6e   : > { %576 = vmatprep.subr.bf16.mxu0 %v878_v0  ;;  %584 = vmatprep.mubr.msk.bf16.mxu0 %vm879_vm0, %v878_v0  ;;  %v691_v3 = vld [vmem:[#allocation6 + $0x10] sm:$0xff]   ;;  %v693_v6 = vld [vmem:[#allocation8] sm:$0xff]   ;;  %v692_v8 = vld [vmem:[#allocation6 + $0x18] sm:$0xff]   ;;  %vm287_vm1 = vcmask 523264   ;;  %s549_s20 = sshll.u32 %s1089_s25, 2  ;;  %s562_s22 = sshll.u32 %s861_s15, 6 }
  0x6f   : > { %588 = vmatprep.subr.bf16.mxu1 %v878_v0  ;;  %596 = vmatprep.mubr.msk.bf16.mxu1 %vm879_vm0, %v878_v0  ;;  %v250_v4 = vld [vmem:[%s217_s11] ss:$2 sm:$0xff]  ;;  %v550_v5 = vld [vmem:[%s217_s11 + $0x1] ss:$2 sm:$0xff]  ;;  %s247_s24 = scalar_lea.vmem [#allocation9], %s549_s20  ;;  %vm412_vm2 = vcmask 519168   ;;  %s1109_s26 = scalar_lea.hbm %s1161_s3, %s562_s22 }
  0x70   : > { %577 = vmatpush3.bf16.msra.mxu0 %v689_v1  ;;  %589 = vmatpush3.bf16.msra.mxu1 %v693_v6  ;;  %v253_v7 = vadd.f32 %v550_v5, %v250_v4  ;;  %v694_v10 = vld [vmem:[#allocation8 + $0x8] sm:$0xff]   ;;  %v695_v11 = vld [vmem:[#allocation8 + $0x10] sm:$0xff]   ;;  %v696_v12 = vld [vmem:[#allocation8 + $0x18] sm:$0xff]   ;;  %s430_s6 = sshll.u32 %s247_s24, 4  ;;  %s415_s30 = scalar_lea.sflag [#allocation5], %s1089_s25  ;;  %s1111_s6 = int_to_ptr.vmem [resolvable:$true] %s430_s6 }
  0x71   : > { %578 = vmatprep.subr.bf16.mxu0 %v878_v0  ;;  %590 = vmatprep.subr.bf16.mxu1 %v878_v0  ;;  %s783_s4 = scalar_lea.vmem %s1111_s6, 64  ;;  %p1176_p2 = scmp.ne.s32.totalorder %s1172_s27, 0 }
  0x72   : > { %v254_v9 = vpack.c.bf16 %v253_v7, %v253_v7  ;;  %p784_p8 = scmp.ne.s32.totalorder %s1111_s6, %s783_s4  ;;  %s880_s15 = smov [#allocation9]  }
  0x73   : > { %s787_s5 = sshll.u32 %s880_s15, 4  ;;  %s788_s5 = int_to_ptr.vmem [resolvable:$false] %s787_s5 }
  0x74   : > { %579 = vmatpush3.bf16.msra.mxu0 %v690_v2  ;;  %591 = vmatpush3.bf16.msra.mxu1 %v694_v10  ;;  %p785_p1 = pnand %p784_p8, %p1176_p2  ;;  %s789_s21 = scalar_lea.vmem %s788_s5, 128 }
  0x75   : > { %580 = vmatprep.subr.bf16.mxu0 %v878_v0  ;;  %592 = vmatprep.subr.bf16.mxu1 %v878_v0  ;;  %p790_p3 = scmp.lt.s32.totalorder %s1111_s6, %s788_s5  ;;  %p791_p5 = scmp.lt.s32.totalorder %s789_s21, %s783_s4 }
  0x76   : > { %p786_p10 = pneg %p785_p1 }
  0x77   : > { %p792_p9 = por %p791_p5, %p790_p3 }
  0x78   : > { %581 = vmatpush3.bf16.msra.mxu0 %v691_v3  ;;  %593 = vmatpush3.bf16.msra.mxu1 %v695_v11 }
  0x79   : > { %582 = vmatprep.subr.bf16.mxu0 %v878_v0  ;;  %594 = vmatprep.subr.bf16.mxu1 %v878_v0  ;;  %p793_p11 = pnand %p792_p9, %p786_p10 }
  0x7c   : > { %583 = vmatpush3.bf16.msra.mxu0 %v692_v8  ;;  %595 = vmatpush3.bf16.msra.mxu1 %v696_v12 }
  0x7f   : > { %585 = vmatmul.mubr.msk.bf16.vlgmr.msra.gmra.mrb[0].mxu0 %vm287_vm1, %v254_v9 }
 0x152   : > { %v325_v13 = vpop.f32.mrb[0].mxu0 }
 0x153   : > { %331 = vst.msk [vmem:[#allocation2] sm:$0xff] %vm287_vm1, %v325_v13  ;;  %v586_v14 = vpop.f32.mrb[1].mxu0 }
 0x154   : > { %v328_v15 = vpop.f32.mrb[2].mxu0 }
 0x155   : > { %v587_v16 = vpop.f32.mrb[3].mxu0 }
 0x15a   : > { %v332_v17 = vld [vmem:[#allocation2] ss:$2 sm:$0xf]  ;;  %v334_v18 = vld [vmem:[#allocation2 + $0x1] ss:$2 sm:$0xf] }
 0x15b   : > { %v335_v19 = vadd.f32 %v334_v18, %v332_v17 }
 0x15d   : > { %v336_v20 = vpack.c.bf16 %v335_v19, %v335_v19 }
 0x15f   : > { %597 = vmatmul.mubr.msk.bf16.vlgmr.msra.gmra.mrb[0].mxu1 %vm287_vm1, %v336_v20 }
 0x232   : > { %v406_v21 = vpop.f32.mrb[0].mxu1 }
 0x233   : > { %413 = vst.msk [vmem:[%s247_s24] sm:$0xf] %vm412_vm2, %v406_v21  ;;  %v598_v22 = vpop.f32.mrb[1].mxu1 }
 0x234   : > { %v409_v23 = vpop.f32.mrb[2].mxu1 }
 0x235   : > { %796 = shalt.err (!%p793_p11)
}
 0x236   : > { %s797_s9 = scalar_lea.hbm %s1109_s26, 64  ;;  %s801_s28 = scalar_lea.hbm %s1161_s3, 128 }
 0x237   : > { %p798_p0 = scmp.ne.s32.totalorder %s1109_s26, %s797_s9  ;;  %p802_p6 = scmp.lt.u32.totalorder %s1109_s26, %s1161_s3 }
 0x238   : > { %p803_p7 = scmp.lt.u32.totalorder %s801_s28, %s797_s9  ;;  %p805_p8 = scmp.lt.u32.totalorder %s797_s9, %s1109_s26 }
 0x239   : > { %p799_p4 = pnand %p798_p0, %p1176_p2 }
 0x23a   : > { %p804_p12 = por %p803_p7, %p802_p6 }
 0x23b   : > { %p800_p13 = pneg %p799_p4 }
 0x23c   : > { %p806_p1 = por %p805_p8, %p804_p12 }
 0x23e   : > { %p807_p10 = pnand %p806_p1, %p800_p13 }
 0x240   : > { %810 = shalt.err (!%p807_p10)
}
 0x241   : > { %610 = dma.vmem_to_hbm [thread:$0]  (%p1176_p2), %s1111_s6, 64, %s1109_s26, %s415_s30   ;;  %v599_v24 = vpop.f32.mrb[3].mxu1 }
 0x242 PF: > { %s442_s20 = sand.u32 1, %s849_s12   ;;  %p1177_p3 = scmp.ne.s32.totalorder %s1169_s23, 0 }
 0x243   : > { %p1178_p5 = scmp.ge.s32.totalorder %s869_s17, 2  ;;  %s443_s22 = scalar_lea.sflag [#allocation5], %s442_s20 }
 0x245   : > { %p624_p9 = pnand %p1178_p5, %p1177_p3 }
 0x247   : > { %844 = dma.done.wait (!%p624_p9), %s443_s22, 64  }
 0x248   : > { %846 = vsyncadd (!%p624_p9), %s443_s22, 4294967232  ;;  %s20_s17 = sadd.s32 1, %s869_s17   ;;  %s1179_s12 = smov %s853_s13 }
 0x249   : > { %p17_p11 = scmp.ge.s32.totalorder %s20_s17, 4   ;;  %s1180_s13 = smov %s857_s14 }
 0x24a   : > { %s1181_s14 = smov %s1043_s18  ;;  %s1182_s15 = smov %s865_s16 }
 0x24b   : > { %s1183_s16 = smov %s1185_s19  ;;  %19 = sbr.rel (!%p17_p11) target bundleno = 7 (0x7), region = 87 }
 0x252   :  { %448 = vsyncpa [#allocation4], 1 }
 0x253   :  { %450 = vsyncpa [#allocation4 + $0x1], 1 }
 0x254   :  { %451 = vsyncpa [#allocation7], 1 }
 0x255   :  { %452 = vsyncpa [#allocation5], 1 }
 0x256   :  { %454 = vsyncpa [#allocation5 + $0x1], 1 }

</bundles_post_ra>
